<compile_context>
chip_gen: v7x
topology: tpu7x:2x2x1
jax: 0.10.0
libtpu: 0.0.40
codegen_flags: <defaults>
</compile_context>

<pallas_src>
import functools

import jax
import jax.numpy as jnp
from jax.experimental import pallas as pl
from jax.experimental.pallas import tpu as pltpu


# Target bytes for one input slab per grid step (per input, single buffer).
# 2 inputs x 2 pipeline buffers x 4 MiB = 16 MiB of input buffering; we pass an
# explicit vmem_limit_bytes so this is safe on v5e (16 MiB scoped default) as
# well as v6e / v7x (32 MiB defaults).
_TARGET_TILE_BYTES = 4 * 1024 * 1024

# Rough cap on the S-resident state (attention block + f32 scratch) per core.
_RESIDENT_BYTES_CAP = 8 * 1024 * 1024


def _default_vmem_limit_bytes():
    """48 MiB unless the chip's physical VMEM is smaller (v7x: 64 MiB)."""
    cap = 64 * 1024 * 1024
    try:
        cap = int(pltpu.get_tpu_info().vmem_capacity_bytes)
    except Exception:
        pass
    return min(48 * 1024 * 1024, (cap * 7) // 8)


def _choose_tiles(B, S, H, itemsize, target_tile_bytes):
    """Pick (TB, TS): batch rows per grid step and seq-tile length."""
    # Prefer 8 rows (16 for 2-byte dtypes at large B) but halve until there are
    # at least two batch blocks so the "parallel" axis can shard across v7x's
    # two TensorCores.  v5e/v6e are single-core and unaffected.
    tb = 16 if (itemsize == 2 and B >= 32) else 8
    tb = min(tb, max(B, 1))
    while tb > 1 and pl.cdiv(B, tb) < 2:
        tb //= 2
    # Bound the S-resident state (attn block + f32 scratch in (tb,1,S) layout,
    # sublane-padded to 8).  TODO(synk): online softmax for very long S.
    while tb > 1 and tb * 8 * S * (4 + 2 * itemsize) > _RESIDENT_BYTES_CAP:
        tb //= 2
    # Sequence tile: whole row if the slab fits the budget, else lane-aligned.
    if tb * S * H * itemsize <= target_tile_bytes:
        return tb, S
    ts = target_tile_bytes // (tb * H * itemsize)
    ts = max(128, (ts // 128) * 128)
    ts = min(ts, S)
    return tb, ts


def _double_dot_attn_kernel(in1_ref, in2_ref, hid_ref, attn_ref, act_ref,
                            act_scratch, *, act, seq_len, ts, precision):
    s_idx = pl.program_id(1)
    last = pl.num_programs(1) - 1

    # MXU contraction: hidden as LHS (M=1, K=H, N=TS), batched over the TB
    # rows.  bf16 inputs are consumed directly (accumulation in f32 happens in
    # the MXU accumulator); no materialized f32 copies of the big slabs.
    dn = (((2,), (2,)), ((0,), (0,)))            # contract H, batch over rows
    h = hid_ref[...]                             # (TB, 1, H), resident block
    a1 = jax.lax.dot_general(h, in1_ref[...], dn,
                             preferred_element_type=jnp.float32,
                             precision=precision)
    a2 = jax.lax.dot_general(h, in2_ref[...], dn,
                             preferred_element_type=jnp.float32,
                             precision=precision)
    act_tile = a1 + a2                           # (TB, 1, TS) f32

    # Stream the raw activations out as lane-dense (TB, 1, TS) blocks.
    act_ref[...] = act_tile.astype(act_ref.dtype)

    # Stash f32 activations; the non-linearity needs the full sequence row.
    s_pad = act_scratch.shape[-1]
    if s_pad == ts:                              # single seq tile
        act_scratch[...] = act_tile
    else:
        start = pl.multiple_of(s_idx * ts, 128)  # ts is a multiple of 128 here
        act_scratch[:, :, pl.ds(start, ts)] = act_tile

    # Finalize the attention distribution on the last seq step.
    @pl.when(s_idx == last)
    def _finalize():
        if s_pad != seq_len:
            # Fill only the padded tail (garbage from the partial last tile)
            # with -inf; cheaper than a full-row iota mask and runs once.
            tail = s_pad - seq_len
            act_scratch[:, :, pl.ds(seq_len, tail)] = jnp.full(
                (act_scratch.shape[0], 1, tail), -jnp.inf, jnp.float32)
        logits = act_scratch[...]                # (TB, 1, s_pad) f32

        if act == "softmax":
            m = jnp.max(logits, axis=-1, keepdims=True)
            e = jnp.exp(logits - m)
            attn = e / jnp.sum(e, axis=-1, keepdims=True)   # exact divide
        else:  # sigmoid
            attn = jax.nn.sigmoid(logits)

        attn_ref[...] = attn[:, :, :seq_len].astype(attn_ref.dtype)


def double_dot_attention(input_1, input_2, hidden, act="softmax", *,
                         activation_dtype=None, vmem_limit_bytes=None):
    """Returns (act_fn(activation), activation), both (B, S)."""
    B, S, H = input_1.shape
    assert input_2.shape == (B, S, H)
    assert hidden.shape == (B, H)
    if act not in ("softmax", "sigmoid"):
        raise ValueError(f"unsupported act: {act}")

    in_dtype = input_1.dtype
    act_dtype = in_dtype if activation_dtype is None else activation_dtype
    itemsize = jnp.dtype(in_dtype).itemsize

    TB, TS = _choose_tiles(B, S, H, itemsize, _TARGET_TILE_BYTES)
    n_b = pl.cdiv(B, TB)
    n_s = pl.cdiv(S, TS)
    s_pad = n_s * TS

    if vmem_limit_bytes is None:
        vmem_limit_bytes = _default_vmem_limit_bytes()

    # Full-precision MXU passes for f32 inputs (matches the elementwise ref);
    # bf16 inputs are native on the MXU.
    precision = (jax.lax.Precision.HIGHEST
                 if jnp.dtype(in_dtype) == jnp.float32 else None)

    # (B, H) -> (B, 1, H): free metadata reshape; keeps everything in a
    # consistent (rows, 1, lanes) layout inside the kernel.
    hidden3 = hidden.reshape(B, 1, H)

    kernel = functools.partial(_double_dot_attn_kernel, act=act, seq_len=S,
                               ts=TS, precision=precision)

    attn3, act3 = pl.pallas_call(
        kernel,
        out_shape=(
            jax.ShapeDtypeStruct((B, 1, S), in_dtype),    # attention
            jax.ShapeDtypeStruct((B, 1, S), act_dtype),   # raw activation
        ),
        grid_spec=pltpu.PrefetchScalarGridSpec(
            num_scalar_prefetch=0,
            grid=(n_b, n_s),
            in_specs=[
                pl.BlockSpec((TB, TS, H), lambda b, s: (b, s, 0)),
                pl.BlockSpec((TB, TS, H), lambda b, s: (b, s, 0)),
                # hidden: block index constant across s -> stays resident.
                pl.BlockSpec((TB, 1, H), lambda b, s: (b, 0, 0)),
            ],
            out_specs=(
                # attention: resident across the seq axis, written at the end.
                pl.BlockSpec((TB, 1, S), lambda b, s: (b, 0, 0)),
                # activation: streamed per seq tile (lane-dense blocks).
                pl.BlockSpec((TB, 1, TS), lambda b, s: (b, 0, s)),
            ),
            scratch_shapes=[pltpu.VMEM((TB, 1, s_pad), jnp.float32)],
        ),
        compiler_params=pltpu.CompilerParams(
            dimension_semantics=("parallel", "arbitrary"),
            vmem_limit_bytes=vmem_limit_bytes,
        ),
    )(input_1, input_2, hidden3)

    return attn3.reshape(B, S), act3.reshape(B, S)


def _reference(input_1, input_2, hidden, act="softmax"):
    h = hidden[:, None, :]
    activation = jnp.sum(input_1 * h, axis=-1) + jnp.sum(input_2 * h, axis=-1)
    if act == "softmax":
        attn = jax.nn.softmax(activation, axis=1)
    else:
        attn = jax.nn.sigmoid(activation)
    return attn, activation


if __name__ == "__main__":
    # DoubleDotAttention has no learnable parameters; only inputs are needed.
    key = jax.random.PRNGKey(0)

    # ---- small shapes consistent with the module ----
    B, S, H = 2, 8, 32
    k1, k2, k3 = jax.random.split(key, 3)
    scale = 0.5
    input_1 = scale * jax.random.normal(k1, (B, S, H), dtype=jnp.float32)
    input_2 = scale * jax.random.normal(k2, (B, S, H), dtype=jnp.float32)
    hidden = scale * jax.random.normal(k3, (B, H), dtype=jnp.float32)

    attn, activation = double_dot_attention(input_1, input_2, hidden, act="softmax")
    jax.block_until_ready((attn, activation))
    ref_attn, ref_act = _reference(input_1, input_2, hidden, act="softmax")
    assert jnp.allclose(activation, ref_act, atol=2e-2, rtol=2e-2)
    assert jnp.allclose(attn, ref_attn, atol=2e-2, rtol=2e-2)

    # sigmoid path
    attn_s, act_s = double_dot_attention(input_1, input_2, hidden, act="sigmoid")
    jax.block_until_ready((attn_s, act_s))
    r_attn_s, r_act_s = _reference(input_1, input_2, hidden, act="sigmoid")
    assert jnp.allclose(act_s, r_act_s, atol=2e-2, rtol=2e-2)
    assert jnp.allclose(attn_s, r_attn_s, atol=2e-2, rtol=2e-2)

    # ---- larger shape exercising the tiled-S / masked-tail / partial-batch path ----
    B2, S2, H2 = 5, 1300, 512
    k4, k5, k6 = jax.random.split(jax.random.PRNGKey(1), 3)
    s2 = float(H2) ** -0.25          # keep logits O(1) so softmax is well-posed
    i1 = s2 * jax.random.normal(k4, (B2, S2, H2), dtype=jnp.float32)
    i2 = s2 * jax.random.normal(k5, (B2, S2, H2), dtype=jnp.float32)
    h2 = s2 * jax.random.normal(k6, (B2, H2), dtype=jnp.float32)
    attn2, act2 = double_dot_attention(i1, i2, h2, act="softmax")
    jax.block_until_ready((attn2, act2))
    r_attn2, r_act2 = _reference(i1, i2, h2, act="softmax")
    assert jnp.allclose(act2, r_act2, atol=2e-2, rtol=2e-2)
    assert jnp.allclose(attn2, r_attn2, atol=2e-2, rtol=2e-2)

    print("KERNEL_OK")
</pallas_src>

<mosaic_0001>
module attributes {stable_mosaic.version = 11 : i64} {
  func.func @_double_dot_attn_kernel(%arg0: i32, %arg1: i32, %arg2: memref<1x8x32xf32, #tpu.memory_space<vmem>>, %arg3: memref<1x8x32xf32, #tpu.memory_space<vmem>>, %arg4: memref<1x1x32xf32, #tpu.memory_space<vmem>>, %arg5: memref<1x1x8xf32, #tpu.memory_space<vmem>>, %arg6: memref<1x1x8xf32, #tpu.memory_space<vmem>>, %arg7: memref<1x1x8xf32, #tpu.memory_space<vmem>>) attributes {dimension_semantics = [#tpu.dimension_semantics<parallel>, #tpu.dimension_semantics<arbitrary>], iteration_bounds = array<i64: 2, 1>, scalar_prefetch = 0 : i64, scratch_operands = 1 : i64, tpu.core_type = #tpu.core_type<tc>, window_params = [{transform_indices = @transform_0, window_bounds = array<i64: 1, 8, 32>}, {transform_indices = @transform_1, window_bounds = array<i64: 1, 8, 32>}, {transform_indices = @transform_2, window_bounds = array<i64: 1, 1, 32>}, {transform_indices = @transform_3, window_bounds = array<i64: 1, 1, 8>}, {transform_indices = @transform_4, window_bounds = array<i64: 1, 1, 8>}]} {
    %c0 = arith.constant 0 : index
    %c0_0 = arith.constant 0 : index
    %c0_1 = arith.constant 0 : index
    %0 = vector.load %arg4[%c0, %c0_0, %c0_1] : memref<1x1x32xf32, #tpu.memory_space<vmem>>, vector<1x1x32xf32>
    %c0_2 = arith.constant 0 : index
    %c0_3 = arith.constant 0 : index
    %c0_4 = arith.constant 0 : index
    %1 = vector.load %arg2[%c0_2, %c0_3, %c0_4] : memref<1x8x32xf32, #tpu.memory_space<vmem>>, vector<1x8x32xf32>
    %cst = arith.constant dense<0.000000e+00> : vector<1x1x8xf32>
    %2 = tpu.matmul %0, %1, %cst {dimension_numbers = #tpu.dot_dimension_numbers<[2], [2], [1], [1], [0, 0, 0, 1, 1, 1], [0], [0]>, precision = #tpu.contract_precision<fp32>} : vector<1x1x32xf32>, vector<1x8x32xf32>, vector<1x1x8xf32> -> vector<1x1x8xf32>
    %c0_5 = arith.constant 0 : index
    %c0_6 = arith.constant 0 : index
    %c0_7 = arith.constant 0 : index
    %3 = vector.load %arg3[%c0_5, %c0_6, %c0_7] : memref<1x8x32xf32, #tpu.memory_space<vmem>>, vector<1x8x32xf32>
    %cst_8 = arith.constant dense<0.000000e+00> : vector<1x1x8xf32>
    %4 = tpu.matmul %0, %3, %cst_8 {dimension_numbers = #tpu.dot_dimension_numbers<[2], [2], [1], [1], [0, 0, 0, 1, 1, 1], [0], [0]>, precision = #tpu.contract_precision<fp32>} : vector<1x1x32xf32>, vector<1x8x32xf32>, vector<1x1x8xf32> -> vector<1x1x8xf32>
    %5 = arith.addf %2, %4 : vector<1x1x8xf32>
    %c0_9 = arith.constant 0 : index
    %c0_10 = arith.constant 0 : index
    %c0_11 = arith.constant 0 : index
    %6 = vector.load %arg6[%c0_9, %c0_10, %c0_11] : memref<1x1x8xf32, #tpu.memory_space<vmem>>, vector<1x1x8xf32>
    tpu.vector_store %arg6[%c0_9, %c0_10, %c0_11], %5 {strides = array<i32>} : memref<1x1x8xf32, #tpu.memory_space<vmem>>, vector<1x1x8xf32>,
    %c0_12 = arith.constant 0 : index
    %c0_13 = arith.constant 0 : index
    %c0_14 = arith.constant 0 : index
    %7 = vector.load %arg7[%c0_12, %c0_13, %c0_14] : memref<1x1x8xf32, #tpu.memory_space<vmem>>, vector<1x1x8xf32>
    tpu.vector_store %arg7[%c0_12, %c0_13, %c0_14], %5 {strides = array<i32>} : memref<1x1x8xf32, #tpu.memory_space<vmem>>, vector<1x1x8xf32>,
    %c0_i32 = arith.constant 0 : i32
    %8 = arith.cmpi eq, %arg1, %c0_i32 : i32
    %9 = arith.extui %8 : i1 to i32
    %c0_i32_15 = arith.constant 0 : i32
    %10 = arith.cmpi ne, %9, %c0_i32_15 : i32
    scf.if %10 {
      %c0_16 = arith.constant 0 : index
      %c0_17 = arith.constant 0 : index
      %c0_18 = arith.constant 0 : index
      %11 = vector.load %arg7[%c0_16, %c0_17, %c0_18] : memref<1x1x8xf32, #tpu.memory_space<vmem>>, vector<1x1x8xf32>
      %cst_19 = arith.constant dense<0xFF800000> : vector<1x1xf32>
      %12 = vector.multi_reduction <maximumf>, %11, %cst_19 [2] : vector<1x1x8xf32> to vector<1x1xf32>
      %13 = vector.shape_cast %12 : vector<1x1xf32> to vector<1x1x1xf32>
      %14 = vector.broadcast %13 : vector<1x1x1xf32> to vector<1x1x8xf32>
      %15 = arith.subf %11, %14 : vector<1x1x8xf32>
      %16 = math.exp %15 : vector<1x1x8xf32>
      %cst_20 = arith.constant dense<0.000000e+00> : vector<1x1xf32>
      %17 = vector.multi_reduction <add>, %16, %cst_20 [2] : vector<1x1x8xf32> to vector<1x1xf32>
      %18 = vector.shape_cast %17 : vector<1x1xf32> to vector<1x1x1xf32>
      %19 = vector.broadcast %18 : vector<1x1x1xf32> to vector<1x1x8xf32>
      %20 = arith.divf %16, %19 : vector<1x1x8xf32>
      %c0_21 = arith.constant 0 : index
      %c0_22 = arith.constant 0 : index
      %c0_23 = arith.constant 0 : index
      %21 = vector.load %arg5[%c0_21, %c0_22, %c0_23] : memref<1x1x8xf32, #tpu.memory_space<vmem>>, vector<1x1x8xf32>
      tpu.vector_store %arg5[%c0_21, %c0_22, %c0_23], %20 {strides = array<i32>} : memref<1x1x8xf32, #tpu.memory_space<vmem>>, vector<1x1x8xf32>,
    } else {
    }
    return
  }
  func.func @transform_0(%arg0: i32, %arg1: i32) -> (i32, i32, i32) {
    %c0_i32 = arith.constant 0 : i32
    %c0_i32_0 = arith.constant 0 : i32
    return %arg0, %arg1, %c0_i32 : i32, i32, i32
  }
  func.func @transform_1(%arg0: i32, %arg1: i32) -> (i32, i32, i32) {
    %c0_i32 = arith.constant 0 : i32
    %c0_i32_0 = arith.constant 0 : i32
    return %arg0, %arg1, %c0_i32 : i32, i32, i32
  }
  func.func @transform_2(%arg0: i32, %arg1: i32) -> (i32, i32, i32) {
    %c0_i32 = arith.constant 0 : i32
    %c0_i32_0 = arith.constant 0 : i32
    %c0_i32_1 = arith.constant 0 : i32
    return %arg0, %c0_i32, %c0_i32_0 : i32, i32, i32
  }
  func.func @transform_3(%arg0: i32, %arg1: i32) -> (i32, i32, i32) {
    %c0_i32 = arith.constant 0 : i32
    %c0_i32_0 = arith.constant 0 : i32
    %c0_i32_1 = arith.constant 0 : i32
    return %arg0, %c0_i32, %c0_i32_0 : i32, i32, i32
  }
  func.func @transform_4(%arg0: i32, %arg1: i32) -> (i32, i32, i32) {
    %c0_i32 = arith.constant 0 : i32
    %c0_i32_0 = arith.constant 0 : i32
    return %arg0, %c0_i32, %arg1 : i32, i32, i32
  }
}

</mosaic_0001>

<bundles_post_ra>
// kernel: tpu_custom_call.1
= control target key start
LH: loop header
LB: loop body
LE: loop exit
PB: predicated region body
PF: predicated region fallthrough
CT: control target
= control target key end

     0   :  { %10 = vsyncpa [#allocation4], 0  ;;  %s2090_s0 = inlined_call_operand.hbm [shape: f32[2,8,32], index: 0, kind: input, shape index: {}]   ;;  %s2091_s1 = inlined_call_operand.hbm [shape: f32[2,8,32], index: 1, kind: input, shape index: {}]   ;;  %s2092_s2 = inlined_call_operand.vmem [shape: f32[2,1,32], index: 2, kind: input, shape index: {}]   ;;  %s2093_s3 = inlined_call_operand.hbm [shape: f32[2,1,8], index: 3, kind: output, shape index: {0}]   ;;  %s2094_s4 = inlined_call_operand.hbm [shape: f32[2,1,8], index: 4, kind: output, shape index: {1}]  }
   0x1   :  { %12 = vsyncpa [#allocation4 + $0x1], 0 }
   0x2   :  { %13 = vsyncpa [#allocation7], 0 }
   0x3   :  { %15 = vsyncpa [#allocation7 + $0x1], 0 }
   0x4   :  { %16 = vsyncpa [#allocation5], 0 }
   0x5   :  { %18 = vsyncpa [#allocation5 + $0x1], 0 }
   0x6   :  { %19 = vsyncpa [#allocation10], 0 }
   0x7   :  { %21 = vsyncpa [#allocation10 + $0x1], 0  ;;  %s1795_s15 = smov 0   ;;  %s1797_s16 = smov 0  }
   0x8   :  { %s1799_s17 = smov 0   ;;  %s1801_s18 = smov 0  }
   0x9   :  { %s1803_s19 = smov 0   ;;  %s1805_s20 = smov 0  }
   0xa LB: > { %s1386_s21 = sadd.s32 4294967295, %s1762_s20   ;;  %s1387_s22 = sadd.s32 4294967294, %s1762_s20   ;;  %s1762_s20 = sphi %s1805_s20, %s27_s20   ;;  %s1758_s19 = sphi %s1803_s19, %s2114_s19   ;;  %s1754_s18 = sphi %s1801_s18, %s2113_s18   ;;  %s1750_s17 = sphi %s1799_s17, %s2112_s17   ;;  %s1746_s16 = sphi %s1797_s16, %s2111_s16   ;;  %s1742_s15 = sphi %s1795_s15, %s2110_s15  }
   0xb   : > { %s39_s23 = sadd.s32 1, %s1758_s19  ;;  %s48_s24 = sadd.s32 1, %s1750_s17 }
   0xc   : > { %p41_p0 = scmp.ge.s32.totalorder %s39_s23, 2  ;;  %p55_p1 = scmp.ne.s32.totalorder %s1750_s17, %s1746_s16 }
   0xd   : > { %p56_p2 = scmp.eq.s32.totalorder %s1762_s20, 0  ;;  %p61_p3 = scmp.ne.s32.totalorder %s1746_s16, %s1742_s15 }
   0xe   : > { %s2116_s23 = smov (%p41_p0, %s39_s23), 0  ;;  %p62_p5 = scmp.eq.s32.totalorder %s1386_s21, 0 }
   0xf   : > { %p1836_p4 = por %p56_p2, %p55_p1  ;;  %s43_s26 = ssub.s32 %s1758_s19, %s2116_s23 }
  0x10   : > { %p139_p6 = scmp.eq.s32.totalorder %s1386_s21, 1  ;;  %p46_p7 = scmp.eq.s32.totalorder %s43_s26, 0 }
  0x11   : > { %p1842_p8 = por %p62_p5, %p61_p3  ;;  %p145_p10 = scmp.eq.s32.totalorder %s1387_s22, 1 }
  0x12   : > { %p1846_p9 = por %p139_p6, %p55_p1  ;;  %p1528_p13 = scmp.lt.s32.totalorder %s1762_s20, 2 }
  0x13   : > { %s2098_s27 = scalar_select %p1842_p8, 1, 0 }
  0x14   : > { %s2099_s28 = scalar_select %p1846_p9, 1, 0 }
  0x15   : > { %s1851_s29 = scalar_select %p46_p7, %s1750_s17, %s48_s24  }
  0x16   : > { %p1853_p11 = por %p145_p10, %p61_p3  ;;  %s1860_s5 = sand.u32 1, %s1750_s17  }
  0x17   : > { %s1390_s6 = sshll.u32 %s1860_s5, 3  ;;  %s1391_s7 = sshll.u32 %s1758_s19, 7 }
  0x18   : > { %s2100_s30 = scalar_select %p1853_p11, 1, 0 }
  0x19   : > { %s1869_s10 = scalar_lea.hbm %s2090_s0, %s1391_s7  ;;  %s197_s11 = scalar_lea.vmem [#allocation3], %s1390_s6 }
  0x1a   : > { %s205_s12 = sshll.u32 %s197_s11, 4  ;;  %p1877_p0 = pnand %p1528_p13, %p1836_p4  ;;  %s1873_s12 = int_to_ptr.vmem [resolvable:$true] %s205_s12 }
  0x1b   : > { %s194_s14 = scalar_lea.sflag [#allocation4], %s1860_s5  ;;  %s1584_s21 = scalar_lea.hbm %s1869_s10, 128 }
  0x1c   : > { %p1585_p3 = scmp.ne.s32.totalorder %s1869_s10, %s1584_s21  ;;  %p1586_p5 = pneg %p1877_p0 }
  0x1d   : > { %s1589_s25 = scalar_lea.hbm %s2090_s0, 256  ;;  %p1590_p4 = scmp.lt.u32.totalorder %s1869_s10, %s2090_s0 }
  0x1e   : > { %p1587_p6 = pnand %p1586_p5, %p1585_p3  ;;  %p1591_p10 = scmp.lt.u32.totalorder %s1589_s25, %s1584_s21 }
  0x1f   : > { %p1593_p12 = scmp.lt.u32.totalorder %s1584_s21, %s1869_s10 }
  0x20   : > { %p1588_p7 = pneg %p1587_p6  ;;  %p1592_p13 = por %p1591_p10, %p1590_p4 }
  0x22   : > { %p1594_p1 = por %p1593_p12, %p1592_p13 }
  0x24   : > { %p1595_p2 = pnand %p1594_p1, %p1588_p7 }
  0x26   : > { %1598 = shalt.err (!%p1595_p2)
}
  0x27   : > { %s1599_s9 = scalar_lea.vmem %s1873_s12, 128  ;;  %s1764_s11 = smov [#allocation3]  }
  0x28   : > { %p1600_p3 = scmp.ne.s32.totalorder %s1873_s12, %s1599_s9  ;;  %s1604_s22 = sshll.u32 %s1764_s11, 4  ;;  %s1605_s22 = int_to_ptr.vmem [resolvable:$false] %s1604_s22 }
  0x29   : > { %s1606_s24 = scalar_lea.vmem %s1605_s22, 256  ;;  %p1607_p9 = scmp.lt.s32.totalorder %s1873_s12, %s1605_s22 }
  0x2a   : > { %p1602_p6 = pnand %p1600_p3, %p1586_p5  ;;  %p1608_p4 = scmp.lt.s32.totalorder %s1606_s24, %s1599_s9 }
  0x2c   : > { %p1603_p11 = pneg %p1602_p6  ;;  %p1609_p10 = por %p1608_p4, %p1607_p9 }
  0x2e   : > { %p1610_p12 = pnand %p1609_p10, %p1603_p11 }
  0x30   : > { %1613 = shalt.err (!%p1610_p12)
}
  0x31   : > { %1517 = dma.hbm_to_vmem [thread:$0]  (!%p1877_p0), %s1869_s10, 128, %s1873_s12, %s194_s14  }
  0x32   : > { %p2102_p1 = scmp.lt.s32.totalorder %s1762_s20, 3  ;;  %p2103_p2 = scmp.ge.s32.totalorder %s1762_s20, 1 }
  0x33   : > { %s1922_s8 = scalar_lea.hbm %s2091_s1, %s1391_s7  ;;  %s216_s9 = scalar_lea.vmem [#allocation6], %s1390_s6 }
  0x34   : > { %p1913_p7 = pnand %p2103_p2, %p2102_p1  ;;  %s224_s11 = sshll.u32 %s216_s9, 4  ;;  %s225_s11 = int_to_ptr.vmem [resolvable:$true] %s224_s11 }
  0x35   : > { %s213_s10 = scalar_lea.sflag [#allocation7], %s1860_s5  ;;  %s1614_s12 = scalar_lea.hbm %s1922_s8, 128 }
  0x36   : > { %s2104_s21 = scalar_select %p1913_p7, 1, 0 }
  0x37   : > { %p1615_p9 = scmp.ne.s32.totalorder %s1922_s8, %s1614_s12  ;;  %s1619_s7 = scalar_lea.hbm %s2091_s1, 256 }
  0x38   : > { %p1620_p3 = scmp.lt.u32.totalorder %s1922_s8, %s2091_s1  ;;  %p1621_p6 = scmp.lt.u32.totalorder %s1619_s7, %s1614_s12 }
  0x39   : > { %p1617_p11 = pnand %p1615_p9, %p1586_p5  ;;  %p1623_p10 = scmp.lt.u32.totalorder %s1614_s12, %s1922_s8 }
  0x3a   : > { %p1622_p4 = por %p1621_p6, %p1620_p3 }
  0x3b   : > { %p1618_p13 = pneg %p1617_p11 }
  0x3c   : > { %p1624_p12 = por %p1623_p10, %p1622_p4 }
  0x3e   : > { %p1625_p1 = pnand %p1624_p12, %p1618_p13 }
  0x40   : > { %1628 = shalt.err (!%p1625_p1)
}
  0x41   : > { %s1629_s5 = scalar_lea.vmem %s225_s11, 128  ;;  %s1765_s6 = smov [#allocation6]  }
  0x42   : > { %p1630_p2 = scmp.ne.s32.totalorder %s225_s11, %s1629_s5  ;;  %s1634_s26 = sshll.u32 %s1765_s6, 4  ;;  %s1635_s26 = int_to_ptr.vmem [resolvable:$false] %s1634_s26 }
  0x43   : > { %s1636_s9 = scalar_lea.vmem %s1635_s26, 256  ;;  %p1637_p8 = scmp.lt.s32.totalorder %s225_s11, %s1635_s26 }
  0x44   : > { %p1632_p9 = pnand %p1630_p2, %p1586_p5  ;;  %p1638_p7 = scmp.lt.s32.totalorder %s1636_s9, %s1629_s5 }
  0x46   : > { %p1633_p11 = pneg %p1632_p9  ;;  %p1639_p3 = por %p1638_p7, %p1637_p8 }
  0x48   : > { %p1640_p6 = pnand %p1639_p3, %p1633_p11 }
  0x4a   : > { %1643 = shalt.err (!%p1640_p6)
}
  0x4b   : > { %1520 = dma.hbm_to_vmem [thread:$0]  (!%p1877_p0), %s1922_s8, 128, %s225_s11, %s213_s10  }
  0x4c   : > { %p2105_p13 = scmp.ne.s32.totalorder %s2104_s21, 0 }
  0x4d   : > { %s1949_s12 = sand.u32 (!%p2105_p13), 1, %s1746_s16   ;;  %p2106_p5 = scmp.ne.s32.totalorder (!%p2105_p13), %s2098_s27, 0 }
  0x4e   : > { %239 = sbr.rel (%p2105_p13) target bundleno = 695 (0x2b7), region = 32  ;;  %s1395_s14 = sshll.u32 (!%p2105_p13), %s1949_s12, 3 }
  0x4f   : > { %s242_s22 = scalar_lea.sflag (!%p2105_p13), [#allocation4], %s1949_s12  ;;  %s245_s7 = scalar_lea.vmem (!%p2105_p13), [#allocation3], %s1395_s14 }
  0x55   : > { %1725 = dma.done.wait (%p2106_p5), %s242_s22, 128  }
  0x56   : > { %1727 = vsyncadd (%p2106_p5), %s242_s22, 4294967168  ;;  %s251_s13 = scalar_lea.sflag [#allocation7], %s1949_s12  ;;  %s254_s8 = scalar_lea.vmem [#allocation6], %s1395_s14 }
  0x57   : > { %1729 = dma.done.wait (%p2106_p5), %s251_s13, 128  }
  0x58   : > { %1731 = vsyncadd (%p2106_p5), %s251_s13, 4294967168  ;;  %p290_p8 = scmp.lt.s32.totalorder %s1754_s18, 1  ;;  %v1766_v0 = vmov 0.0   ;;  %vm1767_vm0 = vmmov 0   ;;  %vm296_vm1 = vcmask 261120   ;;  %v295_v2 = vld [vmem:[%s254_s8] sm:$0xff] }
  0x59   : > { %1425 = vmatprep.subr.mxu1 %v1766_v0  ;;  %1455 = vmatprep.subr.mxu0 %v1766_v0  ;;  %v294_v3 = vld [vmem:[%s245_s7] sm:$0xff]  ;;  %v301_v5 = vsel %vm296_vm1, %v295_v2, 0  ;;  %vm1198_vm2 = vcmask 57344   ;;  %s289_s24 = scalar_lea.vmem [#allocation9], %s1949_s12  ;;  %s1397_s25 = sshll.u32 %s1754_s18, 4 }
  0x5a   : > { %s291_s21 = scalar_select %p290_p8, %s1754_s18, 1  ;;  %1427 = vmatprep.mubr.msk.f32.mxu1 %vm1767_vm0, %v1766_v0  ;;  %1457 = vmatprep.mubr.msk.f32.mxu0 %vm1767_vm0, %v1766_v0  ;;  %v750_v6 = vsel %vm296_vm1, %v294_v3, 0  ;;  %v304_v7 = vand.u32 4294901760, %v301_v5 }
  0x5b   : > { %v753_v9 = vand.u32 4294901760, %v750_v6  ;;  %s2014_s26 = scalar_lea.hbm %s2094_s4, %s1397_s25  ;;  %s1249_s9 = sshll.u32 %s289_s24, 4  ;;  %s1250_s9 = int_to_ptr.vmem [resolvable:$true] %s1249_s9 }
  0x5c   : > { %s292_s27 = scalar_lea.vmem %s2092_s2, %s291_s21  ;;  %1426 = vmatpush3.xpose.msra.mxu1 %v304_v7  ;;  %v381_v10 = vsub.f32 %v301_v5, %v304_v7  ;;  %s1223_s14 = scalar_lea.sflag [#allocation10], %s1949_s12 }
  0x5d   : > { %v293_v1 = vld [vmem:[%s292_s27] sm:$0x1]  ;;  %1456 = vmatpush3.xpose.msra.mxu0 %v753_v9  ;;  %v830_v11 = vsub.f32 %v750_v6, %v753_v9  ;;  %1430 = vmatprep.subr.mxu1 %v1766_v0  ;;  %s1644_s22 = scalar_lea.vmem %s1250_s9, 16  ;;  %p2107_p7 = scmp.ne.s32.totalorder %s2099_s28, 0 }
  0x5e   : > { %v298_v4 = vsel %vm296_vm1, %v293_v1, 0  ;;  %1460 = vmatprep.subr.mxu0 %v1766_v0  ;;  %v382_v14 = vand.u32 4294901760, %v381_v10  ;;  %p1645_p0 = scmp.ne.s32.totalorder %s1250_s9, %s1644_s22  ;;  %s1768_s7 = smov [#allocation9]  }
  0x5f   : > { %v369_v8 = vand.u32 4294901760, %v298_v4  ;;  %v831_v15 = vand.u32 4294901760, %v830_v11  ;;  %s1648_s13 = sshll.u32 %s1768_s7, 4  ;;  %s1649_s13 = int_to_ptr.vmem [resolvable:$false] %s1648_s13 }
  0x60   : > { %v383_v17 = vsub.f32 %v381_v10, %v382_v14  ;;  %p1646_p4 = pnand %p1645_p0, %p2107_p7  ;;  %s1650_s8 = scalar_lea.vmem %s1649_s13, 32 }
  0x61   : > { %v370_v12 = vsub.f32 %v298_v4, %v369_v8  ;;  %v832_v18 = vsub.f32 %v830_v11, %v831_v15  ;;  %p1651_p12 = scmp.lt.s32.totalorder %s1250_s9, %s1649_s13  ;;  %p1652_p1 = scmp.lt.s32.totalorder %s1650_s8, %s1644_s22 }
  0x62   : > { %v384_v20 = vand.u32 4294901760, %v383_v17  ;;  %p1647_p10 = pneg %p1646_p4 }
  0x63   : > { %v371_v13 = vand.u32 4294901760, %v370_v12  ;;  %v833_v21 = vand.u32 4294901760, %v832_v18  ;;  %p1653_p2 = por %p1652_p1, %p1651_p12 }
  0x65   : > { %v372_v16 = vsub.f32 %v370_v12, %v371_v13  ;;  %p1654_p9 = pnand %p1653_p2, %p1647_p10 }
  0x67   : > { %v373_v19 = vand.u32 4294901760, %v372_v16 }
  0x69   : > { %1428 = vmatmul.mubr.f32.vlgmr.msra.gmra.mrb[0].mxu1 %v373_v19  ;;  %1458 = vmatmul.mubr.f32.vlgmr.msra.gmra.mrb[0].mxu0 %v373_v19 }
  0x6a   : > { %1431 = vmatpush3.xpose.msra.mxu1 %v384_v20  ;;  %1461 = vmatpush3.xpose.msra.mxu0 %v833_v21 }
  0x6b   : > { %1432 = vmatprep.mubr.msk.f32.mxu1 %vm1767_vm0, %v1766_v0  ;;  %1435 = vmatprep.subr.mxu1 %v1766_v0 }
  0x6c   : > { %1462 = vmatprep.mubr.msk.f32.mxu0 %vm1767_vm0, %v1766_v0  ;;  %1465 = vmatprep.subr.mxu0 %v1766_v0 }
  0x71   : > { %1433 = vmatmul.mubr.f32.vlgmr.msra.gmra.mrb[0].mxu1 %v369_v8  ;;  %1463 = vmatmul.mubr.f32.vlgmr.msra.gmra.mrb[0].mxu0 %v369_v8 }
  0x72   : > { %1436 = vmatpush3.xpose.msra.mxu1 %v381_v10  ;;  %1466 = vmatpush3.xpose.msra.mxu0 %v830_v11 }
  0x73   : > { %1437 = vmatprep.mubr.msk.f32.mxu1 %vm1767_vm0, %v1766_v0  ;;  %1440 = vmatprep.subr.mxu1 %v1766_v0 }
  0x74   : > { %1467 = vmatprep.mubr.msk.f32.mxu0 %vm1767_vm0, %v1766_v0  ;;  %1470 = vmatprep.subr.mxu0 %v1766_v0 }
  0x79   : > { %1438 = vmatmul.mubr.f32.vlgmr.msra.gmra.mrb[0].mxu1 %v370_v12  ;;  %1468 = vmatmul.mubr.f32.vlgmr.msra.gmra.mrb[0].mxu0 %v370_v12 }
  0x7a   : > { %1441 = vmatpush3.xpose.msra.mxu1 %v304_v7  ;;  %1471 = vmatpush3.xpose.msra.mxu0 %v753_v9 }
  0x7b   : > { %1442 = vmatprep.mubr.msk.f32.mxu1 %vm1767_vm0, %v1766_v0  ;;  %1445 = vmatprep.subr.mxu1 %v1766_v0 }
  0x7c   : > { %1472 = vmatprep.mubr.msk.f32.mxu0 %vm1767_vm0, %v1766_v0  ;;  %1475 = vmatprep.subr.mxu0 %v1766_v0 }
  0x81   : > { %1443 = vmatmul.mubr.f32.vlgmr.msra.gmra.mrb[0].mxu1 %v371_v13  ;;  %1473 = vmatmul.mubr.f32.vlgmr.msra.gmra.mrb[0].mxu0 %v371_v13 }
  0x82   : > { %1446 = vmatpush3.xpose.msra.mxu1 %v382_v14  ;;  %1476 = vmatpush3.xpose.msra.mxu0 %v831_v15 }
  0x83   : > { %1447 = vmatprep.mubr.msk.f32.mxu1 %vm1767_vm0, %v1766_v0  ;;  %1450 = vmatprep.subr.mxu1 %v1766_v0 }
  0x84   : > { %1477 = vmatprep.mubr.msk.f32.mxu0 %vm1767_vm0, %v1766_v0  ;;  %1480 = vmatprep.subr.mxu0 %v1766_v0 }
  0x89   : > { %1448 = vmatmul.mubr.f32.vlgmr.msra.gmra.mrb[0].mxu1 %v369_v8  ;;  %1478 = vmatmul.mubr.f32.vlgmr.msra.gmra.mrb[0].mxu0 %v369_v8 }
  0x8a   : > { %1451 = vmatpush3.xpose.msra.mxu1 %v304_v7  ;;  %1481 = vmatpush3.xpose.msra.mxu0 %v753_v9 }
  0x8b   : > { %1452 = vmatprep.mubr.msk.f32.mxu1 %vm1767_vm0, %v1766_v0  ;;  %1482 = vmatprep.mubr.msk.f32.mxu0 %vm1767_vm0, %v1766_v0 }
  0x91   : > { %1453 = vmatmul.mubr.f32.vlgmr.msra.gmra.mrb[0].mxu1 %v369_v8  ;;  %1483 = vmatmul.mubr.f32.vlgmr.msra.gmra.mrb[0].mxu0 %v369_v8 }
 0x164   : > { %v745_v22 = vpop.f32.mrb[0].mxu1  ;;  %v1194_v23 = vpop.f32.mrb[0].mxu0 }
 0x165   : > { %v1485_v24 = vadd.f32 %v1194_v23, %v745_v22  ;;  %v1454_v25 = vpop.f32.mrb[1].mxu1  ;;  %v1484_v26 = vpop.f32.mrb[1].mxu0 }
 0x167   : > { %1200 = vst.msk [vmem:[#allocation2] sm:$0x1] %vm1198_vm2, %v1485_v24  ;;  %1199 = vst.msk [vmem:[%s289_s24] sm:$0x1] %vm1198_vm2, %v1485_v24 }
 0x16e   : > { %v1205_v27 = vld [vmem:[#allocation2] sm:$0x1] }
 0x16f   : > { %v1206_v28 = vsel %vm1198_vm2, %v1205_v27, -inf }
 0x170   : > { %1207 = vmax.xlane.f32.xlu0 %v1206_v28 }
 0x1fd   : > { %v1208_v29 = vpop.xlane.xlu0 %1207 }
 0x1fe   : > { %v1209_v30 = vsub.f32 %v1205_v27, %v1208_v29 }
 0x200   : > { %v1210_v31 = vmul.f32 1.442695, %v1209_v30 }
 0x202   : > { %1580 = vpow2.f32 %v1210_v31 }
 0x20c   : > { %v1581_v32 = vpop.eup %1580 }
 0x20d   : > { %v1212_v33 = vsel %vm1198_vm2, %v1581_v32, 0.0 }
 0x20e   : > { %1213 = vadd.xlane.f32.xlu0 %v1212_v33 }
 0x20f   : > { %1657 = shalt.err (!%p1654_p9)
}
 0x210   : > { %s1658_s21 = scalar_lea.hbm %s2014_s26, 16  ;;  %s1662_s27 = scalar_lea.hbm %s2094_s4, 32 }
 0x211   : > { %p1659_p11 = scmp.ne.s32.totalorder %s2014_s26, %s1658_s21  ;;  %p1663_p13 = scmp.lt.u32.totalorder %s2014_s26, %s2094_s4 }
 0x212   : > { %p1664_p5 = scmp.lt.u32.totalorder %s1662_s27, %s1658_s21  ;;  %p1666_p0 = scmp.lt.u32.totalorder %s1658_s21, %s2014_s26 }
 0x213   : > { %p1660_p3 = pnand %p1659_p11, %p2107_p7 }
 0x214   : > { %p1665_p8 = por %p1664_p5, %p1663_p13 }
 0x215   : > { %p1661_p6 = pneg %p1660_p3 }
 0x216   : > { %p1667_p4 = por %p1666_p0, %p1665_p8 }
 0x218   : > { %p1668_p10 = pnand %p1667_p4, %p1661_p6 }
 0x21a   : > { %1671 = shalt.err (!%p1668_p10)
}
 0x21b   : > { %1511 = dma.vmem_to_hbm [thread:$0]  (%p2107_p7), %s1250_s9, 16, %s2014_s26, %s1223_s14  }
 0x21c   : > { %s283_s6 = scalar_lea.vmem [#allocation8], %s1949_s12  ;;  %s2040_s8 = scalar_lea.hbm %s2093_s3, %s1397_s25 }
 0x21d   : > { %s1235_s22 = sshll.u32 %s283_s6, 4  ;;  %s1219_s26 = scalar_lea.sflag [#allocation5], %s1949_s12  ;;  %s2042_s22 = int_to_ptr.vmem [resolvable:$true] %s1235_s22 }
 0x21e   : > { %s1672_s9 = scalar_lea.vmem %s2042_s22, 16  ;;  %s1769_s14 = smov [#allocation8]  }
 0x21f   : > { %p1673_p12 = scmp.ne.s32.totalorder %s2042_s22, %s1672_s9  ;;  %s1676_s18 = sshll.u32 %s1769_s14, 4  ;;  %s1677_s18 = int_to_ptr.vmem [resolvable:$false] %s1676_s18 }
 0x220   : > { %s1678_s21 = scalar_lea.vmem %s1677_s18, 32  ;;  %p1679_p9 = scmp.lt.s32.totalorder %s2042_s22, %s1677_s18 }
 0x221   : > { %p1674_p1 = pnand %p1673_p12, %p2107_p7  ;;  %p1680_p11 = scmp.lt.s32.totalorder %s1678_s21, %s1672_s9 }
 0x223   : > { %p1675_p2 = pneg %p1674_p1  ;;  %p1681_p3 = por %p1680_p11, %p1679_p9 }
 0x225   : > { %p1682_p6 = pnand %p1681_p3, %p1675_p2 }
 0x29b   : > { %v1214_v34 = vpop.xlane.xlu0 %1213 }
 0x29c   : > { %1582 = vrcp.f32 %v1214_v34 }
 0x2a6   : > { %v1583_v35 = vpop.eup %1582 }
 0x2a7   : > { %v1216_v36 = vmul.f32 %v1583_v35, %v1581_v32 }
 0x2a9   : > { %1217 = vst.msk [vmem:[%s283_s6] sm:$0x1] %vm1198_vm2, %v1216_v36 }
 0x2aa   : > { %1685 = shalt.err (!%p1682_p6)
}
 0x2ab   : > { %s1686_s12 = scalar_lea.hbm %s2040_s8, 16  ;;  %s1690_s10 = scalar_lea.hbm %s2093_s3, 32 }
 0x2ac   : > { %p1687_p13 = scmp.ne.s32.totalorder %s2040_s8, %s1686_s12  ;;  %p1691_p0 = scmp.lt.u32.totalorder %s2040_s8, %s2093_s3 }
 0x2ad   : > { %p1692_p4 = scmp.lt.u32.totalorder %s1690_s10, %s1686_s12  ;;  %p1694_p12 = scmp.lt.u32.totalorder %s1686_s12, %s2040_s8 }
 0x2ae   : > { %p1688_p5 = pnand %p1687_p13, %p2107_p7 }
 0x2af   : > { %p1693_p10 = por %p1692_p4, %p1691_p0 }
 0x2b0   : > { %p1689_p8 = pneg %p1688_p5 }
 0x2b1   : > { %p1695_p1 = por %p1694_p12, %p1693_p10 }
 0x2b3   : > { %p1696_p2 = pnand %p1695_p1, %p1689_p8 }
 0x2b5   : > { %1699 = shalt.err (!%p1696_p2)
}
 0x2b6   : > { %1510 = dma.vmem_to_hbm [thread:$0]  (%p2107_p7), %s2042_s22, 16, %s2040_s8, %s1219_s26  }
 0x2b7 PF: > { %s1261_s5 = sand.u32 1, %s1742_s15   ;;  %p2108_p9 = scmp.ne.s32.totalorder %s2100_s30, 0 }
 0x2b8   : > { %p2109_p11 = scmp.ge.s32.totalorder %s1762_s20, 2  ;;  %s1262_s6 = scalar_lea.sflag [#allocation5], %s1261_s5 }
 0x2ba   : > { %p1522_p3 = pnand %p2109_p11, %p2108_p9 }
 0x2bc   : > { %1733 = dma.done.wait (!%p1522_p3), %s1262_s6, 16  }
 0x2bd   : > { %1735 = vsyncadd (!%p1522_p3), %s1262_s6, 4294967280  ;;  %s1270_s7 = scalar_lea.sflag [#allocation10], %s1261_s5 }
 0x2be   : > { %1737 = dma.done.wait (!%p1522_p3), %s1270_s7, 16  }
 0x2bf   : > { %1739 = vsyncadd (!%p1522_p3), %s1270_s7, 4294967280  ;;  %s27_s20 = sadd.s32 1, %s1762_s20   ;;  %s2110_s15 = smov %s1746_s16 }
 0x2c0   : > { %p24_p6 = scmp.ge.s32.totalorder %s27_s20, 4   ;;  %s2111_s16 = smov %s1750_s17 }
 0x2c1   : > { %s2112_s17 = smov %s1851_s29  ;;  %s2113_s18 = smov %s1758_s19 }
 0x2c2   : > { %s2114_s19 = smov %s2116_s23  ;;  %26 = sbr.rel (!%p24_p6) target bundleno = 10 (0xa), region = 114 }
 0x2c9   :  { %1274 = vsyncpa [#allocation4], 1 }
 0x2ca   :  { %1276 = vsyncpa [#allocation4 + $0x1], 1 }
 0x2cb   :  { %1277 = vsyncpa [#allocation7], 1 }
 0x2cc   :  { %1279 = vsyncpa [#allocation7 + $0x1], 1 }
 0x2cd   :  { %1280 = vsyncpa [#allocation5], 1 }
 0x2ce   :  { %1282 = vsyncpa [#allocation5 + $0x1], 1 }
 0x2cf   :  { %1283 = vsyncpa [#allocation10], 1 }
 0x2d0   :  { %1285 = vsyncpa [#allocation10 + $0x1], 1 }

</bundles_post_ra>
